<compile_context>
chip_gen: v5e
topology: v5e:2x2
jax: 0.10.0
libtpu: 0.0.40
codegen_flags: <defaults>
</compile_context>

<pallas_src>
import jax
import jax.numpy as jnp
from jax.experimental import pallas as pl
from jax.experimental.pallas import tpu as pltpu


def _round_up(n, m):
    return ((n + m - 1) // m) * m


def _pad_to(a, shape):
    pads = [(0, t - s) for s, t in zip(a.shape, shape)]
    return jnp.pad(a, pads)


def _net_kernel(scal_ref, x_ref, w1_ref, b1_ref, w2_ref, b2_ref, w3_ref, o_ref):
    # scal_ref (SMEM, f32[2]): [prelu_alpha, out_bias]
    x = x_ref[...]                                                    # [TB, 50] bf16

    # fc1 + ReLU (hidden padded to 128 lanes; padded lanes stay exactly 0)
    a1 = jnp.dot(x, w1_ref[...], preferred_element_type=jnp.float32)  # [TB, 128] f32
    h1 = jnp.maximum(a1 + b1_ref[...], 0.0)

    # Dropout(0.2): eval-mode identity.

    # fc2 + PReLU (single shared alpha, scalar from SMEM)
    a2 = jnp.dot(h1.astype(jnp.bfloat16), w2_ref[...],
                 preferred_element_type=jnp.float32)                  # [TB, 128] f32
    a2 = a2 + b2_ref[...]
    alpha = scal_ref[0]
    h2 = jnp.where(a2 >= 0.0, a2, alpha * a2)

    # out + Sigmoid: contract against w3 stored as a [1,128] row so the result
    # is lane-dense [1, TILE_B] (avoids a [TILE_B,1] masked-store path).
    a3 = jax.lax.dot_general(
        w3_ref[...], h2.astype(jnp.bfloat16),
        dimension_numbers=(((1,), (1,)), ((), ())),
        preferred_element_type=jnp.float32)                           # [1, TB] f32
    a3 = a3 + scal_ref[1]
    o_ref[0] = jax.nn.sigmoid(a3).astype(o_ref.dtype)


def net_forward(x, params, *, tile_b=2048):
    """x: [B, 50] float32. params: dict of weights stored [in, out]."""
    B, F = x.shape
    assert F == 50

    # Batch tile: multiple of 128 (lane-dense output), clamped to padded B.
    tile_b = max(128, min(tile_b, _round_up(B, 128)))
    tile_b = _round_up(tile_b, 128)
    b_pad = _round_up(B, tile_b)
    num_tiles = b_pad // tile_b

    x_p = x if b_pad == B else jnp.pad(x, ((0, b_pad - B), (0, 0)))
    x_bf = x_p.astype(jnp.bfloat16)

    # Pad hidden dims to the 128-lane width (zeros), cast weights to bf16 once.
    w1 = _pad_to(params["w1"], (50, 128)).astype(jnp.bfloat16)
    b1 = _pad_to(params["b1"], (1, 128)).astype(jnp.float32)
    w2 = _pad_to(params["w2"], (128, 128)).astype(jnp.bfloat16)
    b2 = _pad_to(params["b2"], (1, 128)).astype(jnp.float32)
    w3_row = _pad_to(params["w3"].T, (1, 128)).astype(jnp.bfloat16)   # [1, 128]

    # SMEM scalars: [prelu_alpha, out_bias]
    scalars = jnp.concatenate(
        [params["prelu_a"].reshape(-1), params["b3"].reshape(-1)]
    ).astype(jnp.float32)

    out = pl.pallas_call(
        _net_kernel,
        grid=(num_tiles,),
        in_specs=[
            pl.BlockSpec(memory_space=pltpu.MemorySpace.SMEM),        # scalars
            pl.BlockSpec((tile_b, 50), lambda i: (i, 0)),             # x (streamed)
            pl.BlockSpec((50, 128), lambda i: (0, 0)),                # w1 (resident)
            pl.BlockSpec((1, 128), lambda i: (0, 0)),                 # b1
            pl.BlockSpec((128, 128), lambda i: (0, 0)),               # w2
            pl.BlockSpec((1, 128), lambda i: (0, 0)),                 # b2
            pl.BlockSpec((1, 128), lambda i: (0, 0)),                 # w3 row
        ],
        out_specs=pl.BlockSpec((1, 1, tile_b), lambda i: (i, 0, 0)),
        out_shape=jax.ShapeDtypeStruct((num_tiles, 1, tile_b), jnp.float32),
        compiler_params=pltpu.CompilerParams(
            dimension_semantics=("parallel",)),
    )(scalars, x_bf, w1, b1, w2, b2, w3_row)

    return out.reshape(b_pad, 1)[:B]


def init_params(key):
    """Deterministic init. PyTorch Linear weight is [out, in]; we store the
    transpose [in, out] so the kernel computes x @ W + b directly."""
    k1, k2, k3, k4, k5, k6 = jax.random.split(key, 6)

    def linear(kw, kb, fan_in, fan_out):
        bound = 1.0 / jnp.sqrt(fan_in)
        w = jax.random.uniform(kw, (fan_in, fan_out), jnp.float32, -bound, bound)
        b = jax.random.uniform(kb, (1, fan_out), jnp.float32, -bound, bound)
        return w, b

    w1, b1 = linear(k1, k2, 50, 50)
    w2, b2 = linear(k3, k4, 50, 100)
    w3, b3 = linear(k5, k6, 100, 1)
    prelu_a = jnp.full((1, 1), 0.25, jnp.float32)  # PyTorch PReLU default init
    return dict(w1=w1, b1=b1, w2=w2, b2=b2, prelu_a=prelu_a, w3=w3, b3=b3)


def net_reference(x, p):
    """Pure-JAX reference with the same bf16-matmul / f32-accumulate recipe."""
    bf16, f32 = jnp.bfloat16, jnp.float32
    a1 = jnp.dot(x.astype(bf16), p["w1"].astype(bf16),
                 preferred_element_type=f32) + p["b1"]
    h1 = jnp.maximum(a1, 0.0)
    a2 = jnp.dot(h1.astype(bf16), p["w2"].astype(bf16),
                 preferred_element_type=f32) + p["b2"]
    alpha = p["prelu_a"][0, 0]
    h2 = jnp.where(a2 >= 0.0, a2, alpha * a2)
    a3 = jnp.dot(h2.astype(bf16), p["w3"].astype(bf16),
                 preferred_element_type=f32) + p["b3"]
    return jax.nn.sigmoid(a3)


if __name__ == "__main__":
    key = jax.random.PRNGKey(0)
    kx, kp = jax.random.split(key)
    B = 300                                  # non-multiple of the tile: exercises padding
    x = jax.random.normal(kx, (B, 50), jnp.float32)
    params = init_params(kp)

    y = net_forward(x, params, tile_b=128)   # small tile for the test; default 2048
    y = jax.block_until_ready(y)

    y_ref = net_reference(x, params)
    assert y.shape == (B, 1)
    assert jnp.allclose(y, y_ref, atol=1e-4, rtol=1e-4), \
        float(jnp.max(jnp.abs(y - y_ref)))
    print("KERNEL_OK")
</pallas_src>

<mosaic_0001>
module attributes {stable_mosaic.version = 11 : i64} {
  func.func @_net_kernel(%arg0: i32, %arg1: memref<2xf32, #tpu.memory_space<smem>>, %arg2: memref<128x50xbf16, #tpu.memory_space<vmem>>, %arg3: memref<50x128xbf16, #tpu.memory_space<vmem>>, %arg4: memref<1x128xf32, #tpu.memory_space<vmem>>, %arg5: memref<128x128xbf16, #tpu.memory_space<vmem>>, %arg6: memref<1x128xf32, #tpu.memory_space<vmem>>, %arg7: memref<1x128xbf16, #tpu.memory_space<vmem>>, %arg8: memref<1x1x128xf32, #tpu.memory_space<vmem>>) attributes {dimension_semantics = [#tpu.dimension_semantics<parallel>], iteration_bounds = array<i64: 3>, scalar_prefetch = 0 : i64, scratch_operands = 0 : i64, tpu.core_type = #tpu.core_type<tc>, window_params = [{transform_indices = @transform_0, window_bounds = array<i64: 2>}, {transform_indices = @transform_1, window_bounds = array<i64: 128, 50>}, {pipeline_mode = #tpu.pipeline_mode<synchronous>, transform_indices = @transform_2, window_bounds = array<i64: 50, 128>}, {pipeline_mode = #tpu.pipeline_mode<synchronous>, transform_indices = @transform_3, window_bounds = array<i64: 1, 128>}, {pipeline_mode = #tpu.pipeline_mode<synchronous>, transform_indices = @transform_4, window_bounds = array<i64: 128, 128>}, {pipeline_mode = #tpu.pipeline_mode<synchronous>, transform_indices = @transform_5, window_bounds = array<i64: 1, 128>}, {pipeline_mode = #tpu.pipeline_mode<synchronous>, transform_indices = @transform_6, window_bounds = array<i64: 1, 128>}, {transform_indices = @transform_7, window_bounds = array<i64: 1, 1, 128>}]} {
    %c0 = arith.constant 0 : index
    %c0_0 = arith.constant 0 : index
    %0 = vector.load %arg2[%c0, %c0_0] : memref<128x50xbf16, #tpu.memory_space<vmem>>, vector<128x50xbf16>
    %c0_1 = arith.constant 0 : index
    %c0_2 = arith.constant 0 : index
    %1 = vector.load %arg3[%c0_1, %c0_2] : memref<50x128xbf16, #tpu.memory_space<vmem>>, vector<50x128xbf16>
    %cst = arith.constant dense<0.000000e+00> : vector<128x128xf32>
    %2 = tpu.matmul %0, %1, %cst {dimension_numbers = #tpu.dot_dimension_numbers<[1], [0], [0], [1], [0, 0, 1, 1], [], []>} : vector<128x50xbf16>, vector<50x128xbf16>, vector<128x128xf32> -> vector<128x128xf32>
    %c0_3 = arith.constant 0 : index
    %c0_4 = arith.constant 0 : index
    %3 = vector.load %arg4[%c0_3, %c0_4] : memref<1x128xf32, #tpu.memory_space<vmem>>, vector<1x128xf32>
    %4 = vector.broadcast %3 : vector<1x128xf32> to vector<128x128xf32>
    %5 = arith.addf %2, %4 : vector<128x128xf32>
    %cst_5 = arith.constant 0.000000e+00 : f32
    %6 = vector.broadcast %cst_5 : f32 to vector<128x128xf32>
    %7 = arith.maximumf %5, %6 : vector<128x128xf32>
    %8 = arith.truncf %7 : vector<128x128xf32> to vector<128x128xbf16>
    %c0_6 = arith.constant 0 : index
    %c0_7 = arith.constant 0 : index
    %9 = vector.load %arg5[%c0_6, %c0_7] : memref<128x128xbf16, #tpu.memory_space<vmem>>, vector<128x128xbf16>
    %cst_8 = arith.constant dense<0.000000e+00> : vector<128x128xf32>
    %10 = tpu.matmul %8, %9, %cst_8 {dimension_numbers = #tpu.dot_dimension_numbers<[1], [0], [0], [1], [0, 0, 1, 1], [], []>} : vector<128x128xbf16>, vector<128x128xbf16>, vector<128x128xf32> -> vector<128x128xf32>
    %c0_9 = arith.constant 0 : index
    %c0_10 = arith.constant 0 : index
    %11 = vector.load %arg6[%c0_9, %c0_10] : memref<1x128xf32, #tpu.memory_space<vmem>>, vector<1x128xf32>
    %12 = vector.broadcast %11 : vector<1x128xf32> to vector<128x128xf32>
    %13 = arith.addf %10, %12 : vector<128x128xf32>
    %c0_11 = arith.constant 0 : index
    %14 = memref.load %arg1[%c0_11] : memref<2xf32, #tpu.memory_space<smem>>
    %cst_12 = arith.constant 0.000000e+00 : f32
    %15 = vector.broadcast %cst_12 : f32 to vector<128x128xf32>
    %16 = arith.cmpf oge, %13, %15 : vector<128x128xf32>
    %17 = vector.broadcast %14 : f32 to vector<128x128xf32>
    %18 = arith.mulf %17, %13 : vector<128x128xf32>
    %19 = arith.select %16, %13, %18 : vector<128x128xi1>, vector<128x128xf32>
    %c0_13 = arith.constant 0 : index
    %c0_14 = arith.constant 0 : index
    %20 = vector.load %arg7[%c0_13, %c0_14] : memref<1x128xbf16, #tpu.memory_space<vmem>>, vector<1x128xbf16>
    %21 = arith.truncf %19 : vector<128x128xf32> to vector<128x128xbf16>
    %cst_15 = arith.constant dense<0.000000e+00> : vector<1x128xf32>
    %22 = tpu.matmul %20, %21, %cst_15 {dimension_numbers = #tpu.dot_dimension_numbers<[1], [1], [0], [0], [0, 0, 1, 0], [], []>} : vector<1x128xbf16>, vector<128x128xbf16>, vector<1x128xf32> -> vector<1x128xf32>
    %c1 = arith.constant 1 : index
    %23 = memref.load %arg1[%c1] : memref<2xf32, #tpu.memory_space<smem>>
    %24 = vector.broadcast %23 : f32 to vector<1x128xf32>
    %25 = arith.addf %22, %24 : vector<1x128xf32>
    %26 = arith.negf %25 : vector<1x128xf32>
    %27 = math.exp %26 : vector<1x128xf32>
    %cst_16 = arith.constant 1.000000e+00 : f32
    %28 = vector.broadcast %cst_16 : f32 to vector<1x128xf32>
    %29 = arith.addf %28, %27 : vector<1x128xf32>
    %30 = arith.divf %28, %29 : vector<1x128xf32>
    %c0_17 = arith.constant 0 : index
    %c0_18 = arith.constant 0 : index
    %c0_19 = arith.constant 0 : index
    %31 = vector.load %arg8[%c0_17, %c0_18, %c0_19] : memref<1x1x128xf32, #tpu.memory_space<vmem>>, vector<1x1x128xf32>
    %32 = vector.shape_cast %31 : vector<1x1x128xf32> to vector<1x128xf32>
    %33 = vector.shape_cast %30 : vector<1x128xf32> to vector<1x1x128xf32>
    tpu.vector_store %arg8[%c0_17, %c0_18, %c0_19], %33 {strides = array<i32>} : memref<1x1x128xf32, #tpu.memory_space<vmem>>, vector<1x1x128xf32>,
    return
  }
  func.func @transform_0(%arg0: i32) -> i32 {
    %c0_i32 = arith.constant 0 : i32
    %c0_i32_0 = arith.constant 0 : i32
    return %c0_i32 : i32
  }
  func.func @transform_1(%arg0: i32) -> (i32, i32) {
    %c0_i32 = arith.constant 0 : i32
    %c0_i32_0 = arith.constant 0 : i32
    return %arg0, %c0_i32 : i32, i32
  }
  func.func @transform_2(%arg0: i32) -> (i32, i32) {
    %c0_i32 = arith.constant 0 : i32
    %c0_i32_0 = arith.constant 0 : i32
    %c0_i32_1 = arith.constant 0 : i32
    return %c0_i32, %c0_i32_0 : i32, i32
  }
  func.func @transform_3(%arg0: i32) -> (i32, i32) {
    %c0_i32 = arith.constant 0 : i32
    %c0_i32_0 = arith.constant 0 : i32
    %c0_i32_1 = arith.constant 0 : i32
    return %c0_i32, %c0_i32_0 : i32, i32
  }
  func.func @transform_4(%arg0: i32) -> (i32, i32) {
    %c0_i32 = arith.constant 0 : i32
    %c0_i32_0 = arith.constant 0 : i32
    %c0_i32_1 = arith.constant 0 : i32
    return %c0_i32, %c0_i32_0 : i32, i32
  }
  func.func @transform_5(%arg0: i32) -> (i32, i32) {
    %c0_i32 = arith.constant 0 : i32
    %c0_i32_0 = arith.constant 0 : i32
    %c0_i32_1 = arith.constant 0 : i32
    return %c0_i32, %c0_i32_0 : i32, i32
  }
  func.func @transform_6(%arg0: i32) -> (i32, i32) {
    %c0_i32 = arith.constant 0 : i32
    %c0_i32_0 = arith.constant 0 : i32
    %c0_i32_1 = arith.constant 0 : i32
    return %c0_i32, %c0_i32_0 : i32, i32
  }
  func.func @transform_7(%arg0: i32) -> (i32, i32, i32) {
    %c0_i32 = arith.constant 0 : i32
    %c0_i32_0 = arith.constant 0 : i32
    %c0_i32_1 = arith.constant 0 : i32
    return %arg0, %c0_i32, %c0_i32_0 : i32, i32, i32
  }
}

</mosaic_0001>

<bundles_post_ra>
// kernel: tpu_custom_call.1
= control target key start
LH: loop header
LB: loop body
LE: loop exit
PB: predicated region body
PF: predicated region fallthrough
CT: control target
= control target key end

     0   :  { %12 = vsyncpa [#allocation4], 0  ;;  %s1282_s0 = inlined_call_operand.vmem [shape: f32[2], index: 0, kind: input, shape index: {}]   ;;  %s1283_s1 = inlined_call_operand.vmem [shape: bf16[384,50], index: 1, kind: input, shape index: {}]   ;;  %s1284_s2 = inlined_call_operand.vmem [shape: bf16[50,128], index: 2, kind: input, shape index: {}]   ;;  %s1285_s3 = inlined_call_operand.vmem [shape: f32[1,128], index: 3, kind: input, shape index: {}]   ;;  %s1286_s4 = inlined_call_operand.vmem [shape: bf16[128,128], index: 4, kind: input, shape index: {}]   ;;  %s1287_s5 = inlined_call_operand.vmem [shape: f32[1,128], index: 5, kind: input, shape index: {}]   ;;  %s1288_s6 = inlined_call_operand.vmem [shape: bf16[1,128], index: 6, kind: input, shape index: {}]   ;;  %s1289_s7 = inlined_call_operand.hbm [shape: f32[3,1,128], index: 7, kind: output, shape index: {}]  }
   0x1   :  { %13 = vsyncpa [#allocation3], 0 }
   0x2   :  { %15 = vsyncpa [#allocation3 + $0x1], 0  ;;  %s1077_s24 = smov 0   ;;  %s1079_s25 = smov 0  }
   0x3   :  { %s1081_s26 = smov 0   ;;  %s1083_s27 = smov 0  }
   0x4 LB: > { %s1098_s28 = sadd.s32 4294967295, %s1034_s27   ;;  %s774_s29 = sadd.s32 4294967294, %s1034_s27   ;;  %s1034_s27 = sphi %s1083_s27, %s1295_s27   ;;  %s1030_s26 = sphi %s1081_s26, %s1294_s26   ;;  %s1026_s25 = sphi %s1079_s25, %s1293_s25   ;;  %s1022_s24 = sphi %s1077_s24, %s1292_s24  }
   0x5   : > { %s1102_s30 = sadd.s32 1, %s1034_s27   ;;  %s180_s8 = sadd.s32 1, %s1030_s26 }
   0x6   : > { %s177_s9 = ssub.s32 %s1034_s27, %s1102_s30  ;;  %p190_p0 = scmp.ne.s32.totalorder %s1030_s26, %s1026_s25 }
   0x7   : > { %p178_p1 = scmp.eq.s32.totalorder %s177_s9, 0  ;;  %p191_p2 = scmp.eq.s32.totalorder %s1098_s28, 2 }
   0x8   : > { %p196_p3 = scmp.ne.s32.totalorder %s1026_s25, %s1022_s24  ;;  %p197_p4 = scmp.eq.s32.totalorder %s774_s29, 2 }
   0x9   : > { %s1113_s10 = scalar_select %p178_p1, %s1030_s26, %s180_s8  }
   0xa   : > { %p1115_p5 = por %p191_p2, %p190_p0  ;;  %p1119_p6 = por %p197_p4, %p196_p3 }
   0xb   : > { %p775_p7 = scmp.ge.s32.totalorder %s1034_s27, 1  ;;  %p204_p8 = scmp.lt.s32.totalorder %s1034_s27, 4 }
   0xc   : > { %p911_p9 = scmp.eq.s32.totalorder %s1098_s28, 0  ;;  %s216_s15 = sshll.u32 %s1282_s0, 4  ;;  %s217_s15 = int_to_ptr.vmem [resolvable:$true] %s216_s15 }
   0xd   : > { %p205_p10 = pnand %p775_p7, %p204_p8  ;;  %s1036_s16 = smov [#allocation2]  }
   0xf   : > { %p903_p11 = pneg %p205_p10  ;;  %253 = sbr.rel (%p205_p10) target bundleno = 671 (0x29f), region = 48 }
  0x11   : > { %p904_p12 = pnand %p911_p9, %p903_p11 }
  0x13   : > { %906 = dma.vmem_to_smem (!%p904_p12), %s217_s15, 16, %s1036_s16, [#allocation4]  }
  0x14   : > { %1013 = dma.done.wait (%p911_p9), [#allocation4], 16  }
  0x15   : > { %1015 = vsyncadd (%p911_p9), [#allocation4], 4294967280 }
  0x16   : > { %260 = sfence }
  0x17   : > { %v315_v0 = vld [vmem:[%s1284_s2 + $0x18] sm:$0x1]  ;;  %s780_s19 = sshll.u32 %s1098_s28, 4  ;;  %vm406_vm0 = vcmask 1040384   ;;  %v880_v4 = vld [vmem:[%s1284_s2 + $0x10] sm:$0xff]  ;;  %v879_v5 = vld [vmem:[%s1284_s2 + $0x8] sm:$0xff]  ;;  %s703_s16 = scalar_lea.hbm %s1289_s7, %s1098_s28 }
  0x18   : > { %v373_v1 = vunpack.c.l.b16 %v315_v0  ;;  %p287_p13 = scmp.lt.s32.totalorder %s780_s19, 47  ;;  %v878_v6 = vld [vmem:[%s1284_s2] sm:$0xff]  ;;  %vm381_vm1 = vcmask 408576   ;;  %v888_v12 = vld [vmem:[%s1286_s4 + $0x38] sm:$0xff]  ;;  %v887_v14 = vld [vmem:[%s1286_s4 + $0x30] sm:$0xff]  ;;  %s866_s8 = sld [smem:[#allocation2 + $0x1]] }
  0x19   : > { %551 = vmatpush.bf16.msra.mxu1 %v888_v12  ;;  %889 = vmatpush.bf16.msra.mxu3 %v888_v12  ;;  %v886_v15 = vld [vmem:[%s1286_s4 + $0x28] sm:$0xff]  ;;  %v885_v16 = vld [vmem:[%s1286_s4 + $0x20] sm:$0xff]  ;;  %v884_v17 = vld [vmem:[%s1286_s4 + $0x18] sm:$0xff]  ;;  %s284_s9 = sand.u32 1, %s1026_s25   ;;  %s988_s23 = scalar_lea.hbm %s1289_s7, 3 }
  0x1a   : > { %v377_v2 = vpack.c.b16 %v373_v1, %v373_v1  ;;  %s1297_s19 = smov (!%p287_p13, %s780_s19), 47  ;;  %v883_v19 = vld [vmem:[%s1286_s4 + $0x10] sm:$0xff]  ;;  %v882_v20 = vld [vmem:[%s1286_s4 + $0x8] sm:$0xff]  ;;  %v881_v21 = vld [vmem:[%s1286_s4] sm:$0xff]  ;;  %s285_s17 = scalar_lea.vmem [#allocation5], %s284_s9 }
  0x1b   : > { %s781_s29 = sshll.u32 %s1297_s19, 2  ;;  %v947_v24 = vld [vmem:[%s1285_s3] ss:$0 sm:$0xff]  ;;  %s705_s18 = sshll.u32 %s285_s17, 4  ;;  %s706_s18 = int_to_ptr.vmem [resolvable:$true] %s705_s18 }
  0x1c   : > { %v408_v3 = vsel %vm406_vm0, %v377_v2, 0  ;;  %s1145_s15 = scalar_lea.vmem %s1283_s1, %s781_s29  ;;  %s707_s19 = sshll.u32 %s703_s16, 4  ;;  %s708_s19 = int_to_ptr.hbm [resolvable:$true] %s707_s19 }
  0x1d   : > { %414 = vmatpush.bf16.msra.mxu0 %v408_v3  ;;  %v870_v7 = vld [vmem:[%s1145_s15] sm:$0xff]  ;;  %v871_v8 = vld [vmem:[%s1145_s15 + $0x8] sm:$0xff]  ;;  %v872_v9 = vld [vmem:[%s1145_s15 + $0x10] sm:$0xff]  ;;  %552 = vmatpush.bf16.msra.mxu1 %v887_v14  ;;  %s695_s20 = scalar_lea.sflag [#allocation3], %s284_s9  ;;  %s982_s28 = sshra.s32 %s708_s19, 4  ;;  %s983_s28 = int_to_ptr.hbm [resolvable:$true] %s982_s28 }
  0x1e   : > { %v873_v10 = vld [vmem:[%s1145_s15 + $0x18] sm:$0xff]  ;;  %v874_v11 = vld [vmem:[%s1145_s15 + $0x20] sm:$0xff]  ;;  %v875_v13 = vld [vmem:[%s1145_s15 + $0x28] sm:$0xff]  ;;  %890 = vmatpush.bf16.msra.mxu3 %v887_v14  ;;  %p989_p3 = scmp.lt.s32.totalorder %s983_s28, %s1289_s7 }
  0x1f   : > { %v876_v18 = vld [vmem:[%s1145_s15 + $0x30] sm:$0xff]  ;;  %v877_v22 = vld [vmem:[%s1145_s15 + $0x38] sm:$0xff]  ;;  %s600_s15 = sld [smem:[#allocation2]] }
  0x21   : > { %415 = vmatpush.bf16.msra.mxu0 %v880_v4  ;;  %553 = vmatpush.bf16.msra.mxu1 %v886_v15 }
  0x22   : > { %891 = vmatpush.bf16.msra.mxu3 %v886_v15 }
  0x25   : > { %416 = vmatpush.bf16.msra.mxu0 %v879_v5  ;;  %554 = vmatpush.bf16.msra.mxu1 %v885_v16 }
  0x26   : > { %892 = vmatpush.bf16.msra.mxu3 %v885_v16 }
  0x29   : > { %417 = vmatpush.bf16.msra.mxu0 %v878_v6  ;;  %555 = vmatpush.bf16.msra.mxu1 %v884_v17 }
  0x2a   : > { %893 = vmatpush.bf16.msra.mxu3 %v884_v17  ;;  %v1193_v17 = vld [vmem:[%s1287_s5] ss:$0 sm:$0xff] }
  0x2c   : > { %826 = vmatmul.msk.bf16.vlgmr.msra.gmra.mxu0 %vm381_vm1, %v870_v7 }
  0x2d   : > { %556 = vmatpush.bf16.msra.mxu1 %v883_v19 }
  0x2e   : > { %894 = vmatpush.bf16.msra.mxu3 %v883_v19  ;;  %v1196_v19 = vstv %s600_s15  ;;  %s984_s15 = scalar_lea.hbm %s983_s28, 1 }
  0x2f   : > { %p985_p0 = scmp.ne.s32.totalorder %s983_s28, %s984_s15  ;;  %p990_p4 = scmp.lt.s32.totalorder %s988_s23, %s984_s15 }
  0x31   : > { %557 = vmatpush.bf16.msra.mxu1 %v882_v20  ;;  %p986_p1 = pnand %p985_p0, %p1115_p5  ;;  %p991_p7 = por %p990_p4, %p989_p3 }
  0x32   : > { %895 = vmatpush.bf16.msra.mxu3 %v882_v20 }
  0x33   : > { %p987_p2 = pneg %p986_p1 }
  0x35   : > { %558 = vmatpush.bf16.msra.mxu1 %v881_v21  ;;  %p992_p8 = pnand %p991_p7, %p987_p2 }
  0x36   : > { %896 = vmatpush.bf16.msra.mxu3 %v881_v21 }
  0x3c   : > { %827 = vmatmul.msk.bf16.gmra.mxu0 %vm381_vm1, %v871_v8 }
  0x4c   : > { %828 = vmatmul.msk.bf16.gmra.mxu0 %vm381_vm1, %v872_v9 }
  0x5c   : > { %829 = vmatmul.msk.bf16.gmra.mxu0 %vm381_vm1, %v873_v10 }
  0x6c   : > { %830 = vmatmul.msk.bf16.gmra.mxu0 %vm381_vm1, %v874_v11 }
  0x7c   : > { %831 = vmatmul.msk.bf16.gmra.mxu0 %vm381_vm1, %v875_v13 }
  0x8c   : > { %832 = vmatmul.msk.bf16.gmra.mxu0 %vm381_vm1, %v876_v18 }
  0x9c   : > { %833 = vmatmul.msk.bf16.gmra.mxu0 %vm381_vm1, %v877_v22 }
  0xa9   : > { %v419_v23 = vpop.f32.mrf.mxu0 }
  0xaa   : > { %v420_v25 = vadd.f32 %v947_v24, %v419_v23 }
  0xac   : > { %v459_v28 = vmax.f32 %v420_v25, 0.0 }
  0xb1   : > { %v421_v26 = vpop.f32.mrf.mxu0 }
  0xb2   : > { %v422_v27 = vadd.f32 %v947_v24, %v421_v26 }
  0xb4   : > { %v460_v29 = vmax.f32 %v422_v27, 0.0 }
  0xb6   : > { %v475_v30 = vpack.c.bf16 %v460_v29, %v459_v28 }
  0xb8   : > { %559 = vmatmul.bf16.vlgmr.msra.gmra.mxu1 %v475_v30 }
  0xb9   : > { %v424_v31 = vpop.f32.mrf.mxu0 }
  0xba   : > { %v425_v32 = vadd.f32 %v947_v24, %v424_v31 }
  0xbc   : > { %v461_v35 = vmax.f32 %v425_v32, 0.0 }
  0xc1   : > { %v426_v33 = vpop.f32.mrf.mxu0 }
  0xc2   : > { %v427_v34 = vadd.f32 %v947_v24, %v426_v33 }
  0xc4   : > { %v462_v36 = vmax.f32 %v427_v34, 0.0 }
  0xc6   : > { %v476_v37 = vpack.c.bf16 %v462_v36, %v461_v35 }
  0xc8   : > { %564 = vmatmul.bf16.gmra.mxu1 %v476_v37 }
  0xc9   : > { %v429_v38 = vpop.f32.mrf.mxu0 }
  0xca   : > { %v430_v39 = vadd.f32 %v947_v24, %v429_v38 }
  0xcc   : > { %v463_v42 = vmax.f32 %v430_v39, 0.0 }
  0xd1   : > { %v431_v40 = vpop.f32.mrf.mxu0 }
  0xd2   : > { %v432_v41 = vadd.f32 %v947_v24, %v431_v40 }
  0xd4   : > { %v464_v43 = vmax.f32 %v432_v41, 0.0 }
  0xd6   : > { %v477_v44 = vpack.c.bf16 %v464_v43, %v463_v42 }
  0xd8   : > { %569 = vmatmul.bf16.gmra.mxu1 %v477_v44 }
  0xd9   : > { %v434_v45 = vpop.f32.mrf.mxu0 }
  0xda   : > { %v435_v46 = vadd.f32 %v947_v24, %v434_v45 }
  0xdc   : > { %v465_v49 = vmax.f32 %v435_v46, 0.0 }
  0xe1   : > { %v436_v47 = vpop.f32.mrf.mxu0 }
  0xe2   : > { %v437_v48 = vadd.f32 %v947_v24, %v436_v47 }
  0xe4   : > { %v466_v50 = vmax.f32 %v437_v48, 0.0 }
  0xe6   : > { %v478_v51 = vpack.c.bf16 %v466_v50, %v465_v49 }
  0xe8   : > { %574 = vmatmul.bf16.gmra.mxu1 %v478_v51 }
  0xe9   : > { %v439_v52 = vpop.f32.mrf.mxu0 }
  0xea   : > { %v440_v53 = vadd.f32 %v947_v24, %v439_v52 }
  0xec   : > { %v467_v56 = vmax.f32 %v440_v53, 0.0 }
  0xf1   : > { %v441_v54 = vpop.f32.mrf.mxu0 }
  0xf2   : > { %v442_v55 = vadd.f32 %v947_v24, %v441_v54 }
  0xf4   : > { %v468_v57 = vmax.f32 %v442_v55, 0.0 }
  0xf6   : > { %v479_v58 = vpack.c.bf16 %v468_v57, %v467_v56 }
  0xf8   : > { %579 = vmatmul.bf16.gmra.mxu1 %v479_v58 }
  0xf9   : > { %v444_v59 = vpop.f32.mrf.mxu0 }
  0xfa   : > { %v445_v60 = vadd.f32 %v947_v24, %v444_v59 }
  0xfc   : > { %v469_v63 = vmax.f32 %v445_v60, 0.0 }
 0x101   : > { %v446_v61 = vpop.f32.mrf.mxu0 }
 0x102   : > { %v447_v62 = vadd.f32 %v947_v24, %v446_v61 }
 0x104   : > { %v470_v0 = vmax.f32 %v447_v62, 0.0 }
 0x106   : > { %v480_v1 = vpack.c.bf16 %v470_v0, %v469_v63 }
 0x108   : > { %584 = vmatmul.bf16.vlgmr.msra.gmra.mxu3 %v480_v1 }
 0x109   : > { %v449_v2 = vpop.f32.mrf.mxu0 }
 0x10a   : > { %v450_v3 = vadd.f32 %v947_v24, %v449_v2 }
 0x10c   : > { %v471_v6 = vmax.f32 %v450_v3, 0.0 }
 0x111   : > { %v451_v4 = vpop.f32.mrf.mxu0 }
 0x112   : > { %v452_v5 = vadd.f32 %v947_v24, %v451_v4 }
 0x114   : > { %v472_v7 = vmax.f32 %v452_v5, 0.0 }
 0x116   : > { %v481_v8 = vpack.c.bf16 %v472_v7, %v471_v6 }
 0x118   : > { %589 = vmatmul.bf16.gmra.mxu3 %v481_v8 }
 0x119   : > { %v454_v9 = vpop.f32.mrf.mxu0 }
 0x11a   : > { %v455_v10 = vadd.f32 %v947_v24, %v454_v9 }
 0x11c   : > { %v473_v13 = vmax.f32 %v455_v10, 0.0 }
 0x121   : > { %v456_v11 = vpop.f32.mrf.mxu0 }
 0x122   : > { %v457_v12 = vadd.f32 %v947_v24, %v456_v11 }
 0x124   : > { %v474_v14 = vmax.f32 %v457_v12, 0.0 }
 0x126   : > { %v482_v15 = vpack.c.bf16 %v474_v14, %v473_v13 }
 0x128   : > { %594 = vmatmul.bf16.gmra.mxu3 %v482_v15 }
 0x135   : > { %v560_v16 = vpop.f32.mrf.mxu1 }
 0x136   : > { %v561_v18 = vadd.f32 %v1193_v17, %v560_v16 }
 0x138   : > { %v618_v21 = vmul.f32 %v1196_v19, %v561_v18  ;;  %vm601_vm2 = vcmp.ge.f32.partialorder %v561_v18, 0.0 }
 0x13a   : > { %v1201_v24 = vsel %vm601_vm2, %v561_v18, %v618_v21 }
 0x13d   : > { %v562_v20 = vpop.f32.mrf.mxu1 }
 0x13e   : > { %v563_v22 = vadd.f32 %v1193_v17, %v562_v20 }
 0x140   : > { %v619_v23 = vmul.f32 %v1196_v19, %v563_v22  ;;  %vm602_vm3 = vcmp.ge.f32.partialorder %v563_v22, 0.0 }
 0x142   : > { %v1203_v25 = vsel %vm602_vm3, %v563_v22, %v619_v23 }
 0x143   : > { %v651_v26 = vpack.c.bf16 %v1203_v25, %v1201_v24 }
 0x145   : > { %v565_v27 = vpop.f32.mrf.mxu1 }
 0x146   : > { %v566_v28 = vadd.f32 %v1193_v17, %v565_v27 }
 0x148   : > { %v620_v30 = vmul.f32 %v1196_v19, %v566_v28  ;;  %vm603_vm4 = vcmp.ge.f32.partialorder %v566_v28, 0.0 }
 0x14a   : > { %v1211_v33 = vsel %vm603_vm4, %v566_v28, %v620_v30 }
 0x14d   : > { %v567_v29 = vpop.f32.mrf.mxu1 }
 0x14e   : > { %v568_v31 = vadd.f32 %v1193_v17, %v567_v29 }
 0x150   : > { %v621_v32 = vmul.f32 %v1196_v19, %v568_v31  ;;  %vm604_vm5 = vcmp.ge.f32.partialorder %v568_v31, 0.0 }
 0x152   : > { %v1213_v34 = vsel %vm604_vm5, %v568_v31, %v621_v32 }
 0x153   : > { %v652_v35 = vpack.c.bf16 %v1213_v34, %v1211_v33 }
 0x155   : > { %v570_v37 = vpop.f32.mrf.mxu1 }
 0x156   : > { %v571_v20 = vadd.f32 %v1193_v17, %v570_v37 }
 0x158   : > { %v622_v27 = vmul.f32 %v1196_v19, %v571_v20  ;;  %vm605_vm1 = vcmp.ge.f32.partialorder %v571_v20, 0.0 }
 0x15a   : > { %v638_v29 = vsel %vm605_vm1, %v571_v20, %v622_v27 }
 0x15d   : > { %v572_v39 = vpop.f32.mrf.mxu1 }
 0x15e   : > { %v573_v16 = vadd.f32 %v1193_v17, %v572_v39 }
 0x160   : > { %v623_v23 = vmul.f32 %v1196_v19, %v573_v16  ;;  %vm606_vm0 = vcmp.ge.f32.partialorder %v573_v16, 0.0 }
 0x162   : > { %v639_v28 = vsel %vm606_vm0, %v573_v16, %v623_v23 }
 0x163   : > { %v653_v30 = vpack.c.bf16 %v639_v28, %v638_v29 }
 0x165   : > { %v575_v42 = vpop.f32.mrf.mxu1 }
 0x166   : > { %v576_v11 = vadd.f32 %v1193_v17, %v575_v42 }
 0x168   : > { %v624_v15 = vmul.f32 %v1196_v19, %v576_v11  ;;  %vm607_vm15 = vcmp.ge.f32.partialorder %v576_v11, 0.0 }
 0x16a   : > { %v640_v21 = vsel %vm607_vm15, %v576_v11, %v624_v15 }
 0x16d   : > { %v577_v44 = vpop.f32.mrf.mxu1 }
 0x16e   : > { %v578_v9 = vadd.f32 %v1193_v17, %v577_v44 }
 0x170   : > { %v625_v14 = vmul.f32 %v1196_v19, %v578_v9  ;;  %vm608_vm14 = vcmp.ge.f32.partialorder %v578_v9, 0.0 }
 0x172   : > { %v641_v18 = vsel %vm608_vm14, %v578_v9, %v625_v14 }
 0x173   : > { %v654_v22 = vpack.c.bf16 %v641_v18, %v640_v21 }
 0x175   : > { %v580_v54 = vpop.f32.mrf.mxu1 }
 0x176   : > { %v581_v4 = vadd.f32 %v1193_v17, %v580_v54 }
 0x178   : > { %v626_v8 = vmul.f32 %v1196_v19, %v581_v4  ;;  %vm609_vm13 = vcmp.ge.f32.partialorder %v581_v4, 0.0 }
 0x17a   : > { %v642_v12 = vsel %vm609_vm13, %v581_v4, %v626_v8 }
 0x17d   : > { %v582_v0 = vpop.f32.mrf.mxu1 }
 0x17e   : > { %v583_v2 = vadd.f32 %v1193_v17, %v582_v0 }
 0x180   : > { %v627_v7 = vmul.f32 %v1196_v19, %v583_v2  ;;  %vm610_vm12 = vcmp.ge.f32.partialorder %v583_v2, 0.0 }
 0x182   : > { %v643_v10 = vsel %vm610_vm12, %v583_v2, %v627_v7 }
 0x183   : > { %v655_v13 = vpack.c.bf16 %v643_v10, %v642_v12 }
 0x18b   : > { %v585_v36 = vpop.f32.mrf.mxu3 }
 0x18c   : > { %v586_v60 = vadd.f32 %v1193_v17, %v585_v36 }
 0x18e   : > { %v628_v1 = vmul.f32 %v1196_v19, %v586_v60  ;;  %vm611_vm11 = vcmp.ge.f32.partialorder %v586_v60, 0.0 }
 0x190   : > { %v644_v5 = vsel %vm611_vm11, %v586_v60, %v628_v1 }
 0x193   : > { %v587_v38 = vpop.f32.mrf.mxu3 }
 0x194   : > { %v588_v58 = vadd.f32 %v1193_v17, %v587_v38 }
 0x196   : > { %v629_v63 = vmul.f32 %v1196_v19, %v588_v58  ;;  %vm612_vm10 = vcmp.ge.f32.partialorder %v588_v58, 0.0 }
 0x198   : > { %v645_v3 = vsel %vm612_vm10, %v588_v58, %v629_v63 }
 0x199   : > { %v656_v6 = vpack.c.bf16 %v645_v3, %v644_v5 }
 0x19b   : > { %v590_v40 = vpop.f32.mrf.mxu3 }
 0x19c   : > { %v591_v51 = vadd.f32 %v1193_v17, %v590_v40 }
 0x19e   : > { %v630_v57 = vmul.f32 %v1196_v19, %v591_v51  ;;  %vm613_vm9 = vcmp.ge.f32.partialorder %v591_v51, 0.0 }
 0x1a0   : > { %v646_v61 = vsel %vm613_vm9, %v591_v51, %v630_v57 }
 0x1a3   : > { %v592_v41 = vpop.f32.mrf.mxu3 }
 0x1a4   : > { %v593_v49 = vadd.f32 %v1193_v17, %v592_v41 }
 0x1a6   : > { %v631_v56 = vmul.f32 %v1196_v19, %v593_v49  ;;  %vm614_vm8 = vcmp.ge.f32.partialorder %v593_v49, 0.0 }
 0x1a8   : > { %v647_v59 = vsel %vm614_vm8, %v593_v49, %v631_v56 }
 0x1a9   : > { %v657_v62 = vpack.c.bf16 %v647_v59, %v646_v61 }
 0x1ab   : > { %v595_v43 = vpop.f32.mrf.mxu3 }
 0x1ac   : > { %v596_v45 = vadd.f32 %v1193_v17, %v595_v43 }
 0x1ae   : > { %v632_v47 = vmul.f32 %v1196_v19, %v596_v45  ;;  %vm615_vm6 = vcmp.ge.f32.partialorder %v596_v45, 0.0 }
 0x1b0   : > { %v648_v52 = vsel %vm615_vm6, %v596_v45, %v632_v47 }
 0x1b3   : > { %v597_v46 = vpop.f32.mrf.mxu3 }
 0x1b4   : > { %v598_v48 = vadd.f32 %v1193_v17, %v597_v46  ;;  %v650_v17 = vld [vmem:[%s1288_s6] sm:$0x1] }
 0x1b6   : > { %v633_v50 = vmul.f32 %v1196_v19, %v598_v48  ;;  %vm616_vm7 = vcmp.ge.f32.partialorder %v598_v48, 0.0  ;;  %v660_v19 = vstv %s866_s8 }
 0x1b8   : > { %v649_v53 = vsel %vm616_vm7, %v598_v48, %v633_v50 }
 0x1b9   : > { %v658_v55 = vpack.c.bf16 %v649_v53, %v648_v52 }
 0x1bb   : > { %661 = vmatpush.bf16.xpose.msra.mxu2 %v658_v55 }
 0x1c3   : > { %662 = vmatpush.bf16.xpose.msra.mxu2 %v657_v62 }
 0x1cb   : > { %663 = vmatpush.bf16.xpose.msra.mxu2 %v656_v6 }
 0x1d3   : > { %664 = vmatpush.bf16.xpose.msra.mxu2 %v655_v13 }
 0x1db   : > { %665 = vmatpush.bf16.xpose.msra.mxu2 %v654_v22 }
 0x1e3   : > { %666 = vmatpush.bf16.xpose.msra.mxu2 %v653_v30 }
 0x1eb   : > { %667 = vmatpush.bf16.xpose.msra.mxu2 %v652_v35 }
 0x1f3   : > { %668 = vmatpush.bf16.xpose.msra.mxu2 %v651_v26 }
 0x1fa   : > { %669 = vmatmul.bf16.vlgmr.msra.gmra.mxu2 %v650_v17 }
 0x27d   : > { %v670_v31 = vpop.f32.mrf.mxu2 }
 0x27e   : > { %v671_v32 = vadd.f32 %v670_v31, %v660_v19 }
 0x280   : > { %v867_v36 = vmul.f32 -1.442695, %v671_v32 }
 0x282   : > { %949 = vpow2.f32 %v867_v36 }
 0x285   : > { %v672_v37 = vpop.f32.mrf.mxu2 }
 0x288   : > { %v950_v33 = vpop.eup %949 }
 0x289   : > { %v677_v34 = vadd.f32 1.0, %v950_v33 }
 0x28b   : > { %951 = vrcp.f32 %v677_v34  ;;  %v689_v26 = vand.u32 2147483648, %v677_v34  ;;  %v687_v39 = vand.u32 2147483647, %v677_v34  ;;  %vm683_vm3 = vweird.f32 %v677_v34 }
 0x28d   : > { %v690_v41 = vor.u32 1.1754944e-38, %v689_v26  ;;  %vm688_vm5 = vcmp.eq.f32.partialorder %v687_v39, 8.507059e+37 }
 0x291   : > { %v952_v35 = vpop.eup %951 }
 0x292   : > { %v679_v24 = vmul.f32 %v952_v35, %v677_v34  ;;  %vm684_vm2 = vweird.f32 %v952_v35 }
 0x293   : > { %vm685_vm4 = vmor %vm683_vm3, %vm684_vm2 }
 0x294   : > { %v680_v25 = vsub.f32 1.0, %v679_v24 }
 0x296   : > { %v681_v38 = vmul.f32 %v952_v35, %v680_v25 }
 0x298   : > { %v682_v40 = vadd.f32 %v952_v35, %v681_v38 }
 0x29a   : > { %v686_v42 = vsel %vm685_vm4, %v952_v35, %v682_v40 }
 0x29b   : > { %v691_v43 = vsel %vm688_vm5, %v690_v41, %v686_v42 }
 0x29c   : > { %693 = vst [vmem:[%s285_s17] sm:$0x1] %v691_v43 }
 0x29d   : > { %995 = shalt.err (!%p992_p8)
}
 0x29e   : > { %901 = dma.vmem_to_hbm [thread:$0]  (%p1115_p5), %s706_s18, 16, %s708_s19, %s695_s20  }
 0x29f PF: > { %p913_p9 = scmp.ge.s32.totalorder %s1034_s27, 2  ;;  %s719_s9 = sand.u32 1, %s1022_s24  }
 0x2a0   : > { %s720_s13 = scalar_lea.sflag [#allocation3], %s719_s9 }
 0x2a1   : > { %p908_p10 = pnand %p913_p9, %p1119_p6 }
 0x2a3   : > { %p909_p11 = pneg %p908_p10 }
 0x2a5   : > { %1017 = dma.done.wait (%p909_p11), %s720_s13, 16  }
 0x2a6   : > { %1019 = vsyncadd (%p909_p11), %s720_s13, 4294967280  ;;  %p18_p12 = scmp.ge.s32.totalorder %s1102_s30, 5   ;;  %s1292_s24 = smov %s1026_s25 }
 0x2a7   : > { %s1293_s25 = smov %s1030_s26  ;;  %s1294_s26 = smov %s1113_s10 }
 0x2a8   : > { %s1295_s27 = smov %s1102_s30  ;;  %20 = sbr.rel (!%p18_p12) target bundleno = 4 (0x4), region = 88 }
 0x2ad   :  { %725 = vsyncpa [#allocation3], 1 }
 0x2ae   :  { %727 = vsyncpa [#allocation3 + $0x1], 1 }
 0x2af   :  { %728 = vsyncpa [#allocation4], 1 }
 0x2b0   :  { %730 = vsyncpa [#allocation4 + $0x1], 1 }

</bundles_post_ra>
